<compile_context>
chip_gen: v5e
topology: v5e:2x2
jax: 0.10.0
libtpu: 0.0.40
codegen_flags: <defaults>
</compile_context>

<pallas_src>
import functools

import jax
import jax.numpy as jnp
from jax.experimental import pallas as pl
from jax.experimental.pallas import tpu as pltpu


def _gather_rows_kernel(labels_ref, table_hbm, out_ref, copy_sem, *, rows_per_step):
    """Gather `rows_per_step` embedding rows from HBM into this step's output tile.

    labels_ref : (B_pad,) int32 in SMEM (scalar-prefetched effective labels)
    table_hbm  : (V, H) embedding table, left in HBM (memory_space=pl.ANY)
    out_ref    : (rows_per_step, H) VMEM output tile for this grid step
    copy_sem   : (rows_per_step,) DMA semaphores
    """
    step = pl.program_id(0)
    base = step * rows_per_step

    # Issue all row DMAs first so they are in flight concurrently, then wait.
    copies = []
    for r in range(rows_per_step):                    # static unroll
        lab = labels_ref[base + r]                    # scalar SMEM read
        cp = pltpu.make_async_copy(
            table_hbm.at[pl.ds(lab, 1)],              # (1, H) row in HBM
            out_ref.at[pl.ds(r, 1)],                  # (1, H) slot of output tile
            copy_sem.at[r],
        )
        cp.start()
        copies.append(cp)
    for cp in copies:
        cp.wait()


def _round_up(x, m):
    return ((x + m - 1) // m) * m


def label_embedder_forward(
    labels,
    embedding_table,
    *,
    num_classes,
    dropout_prob,
    train,
    rng_key=None,
    force_drop_ids=None,
    max_rows_per_step=32,
):
    """Pallas implementation of LabelEmbedder.forward (embedding gather + CFG drop)."""
    labels = labels.astype(jnp.int32)
    b = labels.shape[0]
    v, h = embedding_table.shape

    # --- token_drop semantics, done cheaply in the wrapper (not in the kernel) ---
    use_dropout = dropout_prob > 0
    if (train and use_dropout) or (force_drop_ids is not None):
        if force_drop_ids is None:
            assert rng_key is not None, "rng_key required for training-time label dropout"
            # TODO(synk): semantics match torch.rand(B) < p, but the bitwise RNG
            # stream cannot match PyTorch for a given torch seed.
            drop_ids = jax.random.uniform(rng_key, (b,)) < dropout_prob
        else:
            drop_ids = force_drop_ids == 1
        labels = jnp.where(drop_ids, num_classes, labels)

    # Clamp to a valid row: an out-of-range label would otherwise be an
    # unchecked (potentially faulting) out-of-bounds DMA read.
    eff_labels = jnp.clip(labels, 0, v - 1).astype(jnp.int32)

    # Pick rows-per-step: multiple of 8 (sublane), covers small batches in one
    # step, capped so the static DMA unroll / semaphore count stays modest.
    max_rows_per_step = max(8, _round_up(max_rows_per_step, 8))
    rows_per_step = min(_round_up(b, 8), max_rows_per_step)

    num_steps = pl.cdiv(b, rows_per_step)
    b_pad = num_steps * rows_per_step
    if b_pad != b:
        # Padding rows gather row 0 (valid index); sliced off below.
        eff_labels = jnp.pad(eff_labels, (0, b_pad - b))

    kernel = functools.partial(_gather_rows_kernel, rows_per_step=rows_per_step)

    out = pl.pallas_call(
        kernel,
        out_shape=jax.ShapeDtypeStruct((b_pad, h), embedding_table.dtype),
        grid_spec=pltpu.PrefetchScalarGridSpec(
            num_scalar_prefetch=1,                       # eff_labels -> SMEM
            grid=(num_steps,),
            in_specs=[
                pl.BlockSpec(memory_space=pl.ANY),       # table stays in HBM, no auto-DMA
            ],
            out_specs=pl.BlockSpec(
                (rows_per_step, h), lambda i, labs: (i, 0)
            ),
            scratch_shapes=[pltpu.SemaphoreType.DMA((rows_per_step,))],
        ),
        compiler_params=pltpu.CompilerParams(
            dimension_semantics=("parallel",),           # disjoint output tiles
        ),
    )(eff_labels, embedding_table)

    return out[:b] if b_pad != b else out


if __name__ == "__main__":
    num_classes = 16
    hidden_size = 128        # lane-dense output rows (multiple of 128)
    dropout_prob = 0.1
    batch = 8

    root = jax.random.PRNGKey(0)
    k_table, k_labels, k_drop = jax.random.split(root, 3)

    # nn.Embedding(num_classes + 1, hidden) weights ~ N(0, 1), deterministic here.
    embedding_table = jax.random.normal(
        k_table, (num_classes + 1, hidden_size), dtype=jnp.float32
    )
    labels = jax.random.randint(k_labels, (batch,), 0, num_classes, dtype=jnp.int32)

    # train=True path (random label dropout for CFG) — just run it.
    out_train = label_embedder_forward(
        labels, embedding_table,
        num_classes=num_classes, dropout_prob=dropout_prob,
        train=True, rng_key=k_drop,
    )
    jax.block_until_ready(out_train)
    assert out_train.shape == (batch, hidden_size)

    # eval path (no dropout) — exact equality with a plain gather reference.
    out_eval = label_embedder_forward(
        labels, embedding_table,
        num_classes=num_classes, dropout_prob=dropout_prob, train=False,
    )
    jax.block_until_ready(out_eval)
    ref_eval = embedding_table[labels]
    assert out_eval.shape == (batch, hidden_size)
    assert jnp.allclose(out_eval, ref_eval)

    # force_drop_ids path — dropped labels map to the CFG row (num_classes).
    force = jnp.array([1, 0, 1, 0, 0, 1, 0, 1], jnp.int32)
    out_forced = label_embedder_forward(
        labels, embedding_table,
        num_classes=num_classes, dropout_prob=dropout_prob, train=False,
        force_drop_ids=force,
    )
    jax.block_until_ready(out_forced)
    ref_forced = embedding_table[jnp.where(force == 1, num_classes, labels)]
    assert jnp.allclose(out_forced, ref_forced)

    # non-multiple batch (exercises padding path).
    labels5 = labels[:5]
    out5 = label_embedder_forward(
        labels5, embedding_table,
        num_classes=num_classes, dropout_prob=dropout_prob, train=False,
    )
    jax.block_until_ready(out5)
    assert out5.shape == (5, hidden_size)
    assert jnp.allclose(out5, embedding_table[labels5])

    # larger batch (exercises multi-step grid + auto rows_per_step).
    k_big = jax.random.PRNGKey(7)
    labels_big = jax.random.randint(k_big, (40,), 0, num_classes, dtype=jnp.int32)
    out_big = label_embedder_forward(
        labels_big, embedding_table,
        num_classes=num_classes, dropout_prob=dropout_prob, train=False,
    )
    jax.block_until_ready(out_big)
    assert out_big.shape == (40, hidden_size)
    assert jnp.allclose(out_big, embedding_table[labels_big])

    print("KERNEL_OK")
</pallas_src>

<mosaic_0001>
module attributes {stable_mosaic.version = 11 : i64} {
  func.func @_gather_rows_kernel(%arg0: i32, %arg1: memref<8xi32, #tpu.memory_space<smem>>, %arg2: memref<17x128xf32, #tpu.memory_space<any>>, %arg3: memref<8x128xf32, #tpu.memory_space<vmem>>, %arg4: memref<8x!tpu.dma_semaphore, #tpu.memory_space<semaphore_mem>>) attributes {dimension_semantics = [#tpu.dimension_semantics<parallel>], iteration_bounds = array<i64: 1>, scalar_prefetch = 1 : i64, scratch_operands = 1 : i64, tpu.core_type = #tpu.core_type<tc>, window_params = [{}, {transform_indices = @transform_1, window_bounds = array<i64: 8, 128>}]} {
    %c8_i32 = arith.constant 8 : i32
    %0 = arith.muli %arg0, %c8_i32 : i32
    %c0_i32 = arith.constant 0 : i32
    %1 = arith.addi %0, %c0_i32 : i32
    %2 = arith.index_cast %1 : i32 to index
    %3 = memref.load %arg1[%2] : memref<8xi32, #tpu.memory_space<smem>>
    %c0_i32_0 = arith.constant 0 : i32
    %c0_i32_1 = arith.constant 0 : i32
    %4 = tpu.memref_slice %arg2[%3, %c0_i32_1] : memref<17x128xf32, #tpu.memory_space<any>> -> memref<1x128xf32, #tpu.memory_space<any>>
    %c0_i32_2 = arith.constant 0 : i32
    %c0_i32_3 = arith.constant 0 : i32
    %5 = tpu.memref_slice %arg3[%c0_i32_2, %c0_i32_3] : memref<8x128xf32, #tpu.memory_space<vmem>> -> memref<1x128xf32, #tpu.memory_space<vmem>>
    %6 = tpu.memref_slice %arg4[%c0_i32_0] : memref<8x!tpu.dma_semaphore, #tpu.memory_space<semaphore_mem>> -> memref<1x!tpu.dma_semaphore, #tpu.memory_space<semaphore_mem>>
    %7 = tpu.memref_squeeze %6 : memref<1x!tpu.dma_semaphore, #tpu.memory_space<semaphore_mem>> -> memref<!tpu.dma_semaphore, #tpu.memory_space<semaphore_mem>>
    tpu.enqueue_dma source(%4 : memref<1x128xf32, #tpu.memory_space<any>>) target(%5 : memref<1x128xf32, #tpu.memory_space<vmem>>) target_semaphore(%7 : memref<!tpu.dma_semaphore, #tpu.memory_space<semaphore_mem>>)
    %c1_i32 = arith.constant 1 : i32
    %8 = arith.addi %0, %c1_i32 : i32
    %9 = arith.index_cast %8 : i32 to index
    %10 = memref.load %arg1[%9] : memref<8xi32, #tpu.memory_space<smem>>
    %c1_i32_4 = arith.constant 1 : i32
    %c0_i32_5 = arith.constant 0 : i32
    %11 = tpu.memref_slice %arg2[%10, %c0_i32_5] : memref<17x128xf32, #tpu.memory_space<any>> -> memref<1x128xf32, #tpu.memory_space<any>>
    %c1_i32_6 = arith.constant 1 : i32
    %c0_i32_7 = arith.constant 0 : i32
    %12 = tpu.memref_slice %arg3[%c1_i32_6, %c0_i32_7] : memref<8x128xf32, #tpu.memory_space<vmem>> -> memref<1x128xf32, #tpu.memory_space<vmem>>
    %13 = tpu.memref_slice %arg4[%c1_i32_4] : memref<8x!tpu.dma_semaphore, #tpu.memory_space<semaphore_mem>> -> memref<1x!tpu.dma_semaphore, #tpu.memory_space<semaphore_mem>>
    %14 = tpu.memref_squeeze %13 : memref<1x!tpu.dma_semaphore, #tpu.memory_space<semaphore_mem>> -> memref<!tpu.dma_semaphore, #tpu.memory_space<semaphore_mem>>
    tpu.enqueue_dma source(%11 : memref<1x128xf32, #tpu.memory_space<any>>) target(%12 : memref<1x128xf32, #tpu.memory_space<vmem>>) target_semaphore(%14 : memref<!tpu.dma_semaphore, #tpu.memory_space<semaphore_mem>>)
    %c2_i32 = arith.constant 2 : i32
    %15 = arith.addi %0, %c2_i32 : i32
    %16 = arith.index_cast %15 : i32 to index
    %17 = memref.load %arg1[%16] : memref<8xi32, #tpu.memory_space<smem>>
    %c2_i32_8 = arith.constant 2 : i32
    %c0_i32_9 = arith.constant 0 : i32
    %18 = tpu.memref_slice %arg2[%17, %c0_i32_9] : memref<17x128xf32, #tpu.memory_space<any>> -> memref<1x128xf32, #tpu.memory_space<any>>
    %c2_i32_10 = arith.constant 2 : i32
    %c0_i32_11 = arith.constant 0 : i32
    %19 = tpu.memref_slice %arg3[%c2_i32_10, %c0_i32_11] : memref<8x128xf32, #tpu.memory_space<vmem>> -> memref<1x128xf32, #tpu.memory_space<vmem>>
    %20 = tpu.memref_slice %arg4[%c2_i32_8] : memref<8x!tpu.dma_semaphore, #tpu.memory_space<semaphore_mem>> -> memref<1x!tpu.dma_semaphore, #tpu.memory_space<semaphore_mem>>
    %21 = tpu.memref_squeeze %20 : memref<1x!tpu.dma_semaphore, #tpu.memory_space<semaphore_mem>> -> memref<!tpu.dma_semaphore, #tpu.memory_space<semaphore_mem>>
    tpu.enqueue_dma source(%18 : memref<1x128xf32, #tpu.memory_space<any>>) target(%19 : memref<1x128xf32, #tpu.memory_space<vmem>>) target_semaphore(%21 : memref<!tpu.dma_semaphore, #tpu.memory_space<semaphore_mem>>)
    %c3_i32 = arith.constant 3 : i32
    %22 = arith.addi %0, %c3_i32 : i32
    %23 = arith.index_cast %22 : i32 to index
    %24 = memref.load %arg1[%23] : memref<8xi32, #tpu.memory_space<smem>>
    %c3_i32_12 = arith.constant 3 : i32
    %c0_i32_13 = arith.constant 0 : i32
    %25 = tpu.memref_slice %arg2[%24, %c0_i32_13] : memref<17x128xf32, #tpu.memory_space<any>> -> memref<1x128xf32, #tpu.memory_space<any>>
    %c3_i32_14 = arith.constant 3 : i32
    %c0_i32_15 = arith.constant 0 : i32
    %26 = tpu.memref_slice %arg3[%c3_i32_14, %c0_i32_15] : memref<8x128xf32, #tpu.memory_space<vmem>> -> memref<1x128xf32, #tpu.memory_space<vmem>>
    %27 = tpu.memref_slice %arg4[%c3_i32_12] : memref<8x!tpu.dma_semaphore, #tpu.memory_space<semaphore_mem>> -> memref<1x!tpu.dma_semaphore, #tpu.memory_space<semaphore_mem>>
    %28 = tpu.memref_squeeze %27 : memref<1x!tpu.dma_semaphore, #tpu.memory_space<semaphore_mem>> -> memref<!tpu.dma_semaphore, #tpu.memory_space<semaphore_mem>>
    tpu.enqueue_dma source(%25 : memref<1x128xf32, #tpu.memory_space<any>>) target(%26 : memref<1x128xf32, #tpu.memory_space<vmem>>) target_semaphore(%28 : memref<!tpu.dma_semaphore, #tpu.memory_space<semaphore_mem>>)
    %c4_i32 = arith.constant 4 : i32
    %29 = arith.addi %0, %c4_i32 : i32
    %30 = arith.index_cast %29 : i32 to index
    %31 = memref.load %arg1[%30] : memref<8xi32, #tpu.memory_space<smem>>
    %c4_i32_16 = arith.constant 4 : i32
    %c0_i32_17 = arith.constant 0 : i32
    %32 = tpu.memref_slice %arg2[%31, %c0_i32_17] : memref<17x128xf32, #tpu.memory_space<any>> -> memref<1x128xf32, #tpu.memory_space<any>>
    %c4_i32_18 = arith.constant 4 : i32
    %c0_i32_19 = arith.constant 0 : i32
    %33 = tpu.memref_slice %arg3[%c4_i32_18, %c0_i32_19] : memref<8x128xf32, #tpu.memory_space<vmem>> -> memref<1x128xf32, #tpu.memory_space<vmem>>
    %34 = tpu.memref_slice %arg4[%c4_i32_16] : memref<8x!tpu.dma_semaphore, #tpu.memory_space<semaphore_mem>> -> memref<1x!tpu.dma_semaphore, #tpu.memory_space<semaphore_mem>>
    %35 = tpu.memref_squeeze %34 : memref<1x!tpu.dma_semaphore, #tpu.memory_space<semaphore_mem>> -> memref<!tpu.dma_semaphore, #tpu.memory_space<semaphore_mem>>
    tpu.enqueue_dma source(%32 : memref<1x128xf32, #tpu.memory_space<any>>) target(%33 : memref<1x128xf32, #tpu.memory_space<vmem>>) target_semaphore(%35 : memref<!tpu.dma_semaphore, #tpu.memory_space<semaphore_mem>>)
    %c5_i32 = arith.constant 5 : i32
    %36 = arith.addi %0, %c5_i32 : i32
    %37 = arith.index_cast %36 : i32 to index
    %38 = memref.load %arg1[%37] : memref<8xi32, #tpu.memory_space<smem>>
    %c5_i32_20 = arith.constant 5 : i32
    %c0_i32_21 = arith.constant 0 : i32
    %39 = tpu.memref_slice %arg2[%38, %c0_i32_21] : memref<17x128xf32, #tpu.memory_space<any>> -> memref<1x128xf32, #tpu.memory_space<any>>
    %c5_i32_22 = arith.constant 5 : i32
    %c0_i32_23 = arith.constant 0 : i32
    %40 = tpu.memref_slice %arg3[%c5_i32_22, %c0_i32_23] : memref<8x128xf32, #tpu.memory_space<vmem>> -> memref<1x128xf32, #tpu.memory_space<vmem>>
    %41 = tpu.memref_slice %arg4[%c5_i32_20] : memref<8x!tpu.dma_semaphore, #tpu.memory_space<semaphore_mem>> -> memref<1x!tpu.dma_semaphore, #tpu.memory_space<semaphore_mem>>
    %42 = tpu.memref_squeeze %41 : memref<1x!tpu.dma_semaphore, #tpu.memory_space<semaphore_mem>> -> memref<!tpu.dma_semaphore, #tpu.memory_space<semaphore_mem>>
    tpu.enqueue_dma source(%39 : memref<1x128xf32, #tpu.memory_space<any>>) target(%40 : memref<1x128xf32, #tpu.memory_space<vmem>>) target_semaphore(%42 : memref<!tpu.dma_semaphore, #tpu.memory_space<semaphore_mem>>)
    %c6_i32 = arith.constant 6 : i32
    %43 = arith.addi %0, %c6_i32 : i32
    %44 = arith.index_cast %43 : i32 to index
    %45 = memref.load %arg1[%44] : memref<8xi32, #tpu.memory_space<smem>>
    %c6_i32_24 = arith.constant 6 : i32
    %c0_i32_25 = arith.constant 0 : i32
    %46 = tpu.memref_slice %arg2[%45, %c0_i32_25] : memref<17x128xf32, #tpu.memory_space<any>> -> memref<1x128xf32, #tpu.memory_space<any>>
    %c6_i32_26 = arith.constant 6 : i32
    %c0_i32_27 = arith.constant 0 : i32
    %47 = tpu.memref_slice %arg3[%c6_i32_26, %c0_i32_27] : memref<8x128xf32, #tpu.memory_space<vmem>> -> memref<1x128xf32, #tpu.memory_space<vmem>>
    %48 = tpu.memref_slice %arg4[%c6_i32_24] : memref<8x!tpu.dma_semaphore, #tpu.memory_space<semaphore_mem>> -> memref<1x!tpu.dma_semaphore, #tpu.memory_space<semaphore_mem>>
    %49 = tpu.memref_squeeze %48 : memref<1x!tpu.dma_semaphore, #tpu.memory_space<semaphore_mem>> -> memref<!tpu.dma_semaphore, #tpu.memory_space<semaphore_mem>>
    tpu.enqueue_dma source(%46 : memref<1x128xf32, #tpu.memory_space<any>>) target(%47 : memref<1x128xf32, #tpu.memory_space<vmem>>) target_semaphore(%49 : memref<!tpu.dma_semaphore, #tpu.memory_space<semaphore_mem>>)
    %c7_i32 = arith.constant 7 : i32
    %50 = arith.addi %0, %c7_i32 : i32
    %51 = arith.index_cast %50 : i32 to index
    %52 = memref.load %arg1[%51] : memref<8xi32, #tpu.memory_space<smem>>
    %c7_i32_28 = arith.constant 7 : i32
    %c0_i32_29 = arith.constant 0 : i32
    %53 = tpu.memref_slice %arg2[%52, %c0_i32_29] : memref<17x128xf32, #tpu.memory_space<any>> -> memref<1x128xf32, #tpu.memory_space<any>>
    %c7_i32_30 = arith.constant 7 : i32
    %c0_i32_31 = arith.constant 0 : i32
    %54 = tpu.memref_slice %arg3[%c7_i32_30, %c0_i32_31] : memref<8x128xf32, #tpu.memory_space<vmem>> -> memref<1x128xf32, #tpu.memory_space<vmem>>
    %55 = tpu.memref_slice %arg4[%c7_i32_28] : memref<8x!tpu.dma_semaphore, #tpu.memory_space<semaphore_mem>> -> memref<1x!tpu.dma_semaphore, #tpu.memory_space<semaphore_mem>>
    %56 = tpu.memref_squeeze %55 : memref<1x!tpu.dma_semaphore, #tpu.memory_space<semaphore_mem>> -> memref<!tpu.dma_semaphore, #tpu.memory_space<semaphore_mem>>
    tpu.enqueue_dma source(%53 : memref<1x128xf32, #tpu.memory_space<any>>) target(%54 : memref<1x128xf32, #tpu.memory_space<vmem>>) target_semaphore(%56 : memref<!tpu.dma_semaphore, #tpu.memory_space<semaphore_mem>>)
    %c0_i32_32 = arith.constant 0 : i32
    %c0_i32_33 = arith.constant 0 : i32
    %57 = tpu.memref_slice %arg2[%3, %c0_i32_33] : memref<17x128xf32, #tpu.memory_space<any>> -> memref<1x128xf32, #tpu.memory_space<any>>
    %c0_i32_34 = arith.constant 0 : i32
    %c0_i32_35 = arith.constant 0 : i32
    %58 = tpu.memref_slice %arg3[%c0_i32_34, %c0_i32_35] : memref<8x128xf32, #tpu.memory_space<vmem>> -> memref<1x128xf32, #tpu.memory_space<vmem>>
    %59 = tpu.memref_slice %arg4[%c0_i32_32] : memref<8x!tpu.dma_semaphore, #tpu.memory_space<semaphore_mem>> -> memref<1x!tpu.dma_semaphore, #tpu.memory_space<semaphore_mem>>
    %60 = tpu.memref_squeeze %59 : memref<1x!tpu.dma_semaphore, #tpu.memory_space<semaphore_mem>> -> memref<!tpu.dma_semaphore, #tpu.memory_space<semaphore_mem>>
    tpu.wait_dma2 semaphore(%60 : memref<!tpu.dma_semaphore, #tpu.memory_space<semaphore_mem>>) src(%57 : memref<1x128xf32, #tpu.memory_space<any>>) dst(%58 : memref<1x128xf32, #tpu.memory_space<vmem>>)
    %c1_i32_36 = arith.constant 1 : i32
    %c0_i32_37 = arith.constant 0 : i32
    %61 = tpu.memref_slice %arg2[%10, %c0_i32_37] : memref<17x128xf32, #tpu.memory_space<any>> -> memref<1x128xf32, #tpu.memory_space<any>>
    %c1_i32_38 = arith.constant 1 : i32
    %c0_i32_39 = arith.constant 0 : i32
    %62 = tpu.memref_slice %arg3[%c1_i32_38, %c0_i32_39] : memref<8x128xf32, #tpu.memory_space<vmem>> -> memref<1x128xf32, #tpu.memory_space<vmem>>
    %63 = tpu.memref_slice %arg4[%c1_i32_36] : memref<8x!tpu.dma_semaphore, #tpu.memory_space<semaphore_mem>> -> memref<1x!tpu.dma_semaphore, #tpu.memory_space<semaphore_mem>>
    %64 = tpu.memref_squeeze %63 : memref<1x!tpu.dma_semaphore, #tpu.memory_space<semaphore_mem>> -> memref<!tpu.dma_semaphore, #tpu.memory_space<semaphore_mem>>
    tpu.wait_dma2 semaphore(%64 : memref<!tpu.dma_semaphore, #tpu.memory_space<semaphore_mem>>) src(%61 : memref<1x128xf32, #tpu.memory_space<any>>) dst(%62 : memref<1x128xf32, #tpu.memory_space<vmem>>)
    %c2_i32_40 = arith.constant 2 : i32
    %c0_i32_41 = arith.constant 0 : i32
    %65 = tpu.memref_slice %arg2[%17, %c0_i32_41] : memref<17x128xf32, #tpu.memory_space<any>> -> memref<1x128xf32, #tpu.memory_space<any>>
    %c2_i32_42 = arith.constant 2 : i32
    %c0_i32_43 = arith.constant 0 : i32
    %66 = tpu.memref_slice %arg3[%c2_i32_42, %c0_i32_43] : memref<8x128xf32, #tpu.memory_space<vmem>> -> memref<1x128xf32, #tpu.memory_space<vmem>>
    %67 = tpu.memref_slice %arg4[%c2_i32_40] : memref<8x!tpu.dma_semaphore, #tpu.memory_space<semaphore_mem>> -> memref<1x!tpu.dma_semaphore, #tpu.memory_space<semaphore_mem>>
    %68 = tpu.memref_squeeze %67 : memref<1x!tpu.dma_semaphore, #tpu.memory_space<semaphore_mem>> -> memref<!tpu.dma_semaphore, #tpu.memory_space<semaphore_mem>>
    tpu.wait_dma2 semaphore(%68 : memref<!tpu.dma_semaphore, #tpu.memory_space<semaphore_mem>>) src(%65 : memref<1x128xf32, #tpu.memory_space<any>>) dst(%66 : memref<1x128xf32, #tpu.memory_space<vmem>>)
    %c3_i32_44 = arith.constant 3 : i32
    %c0_i32_45 = arith.constant 0 : i32
    %69 = tpu.memref_slice %arg2[%24, %c0_i32_45] : memref<17x128xf32, #tpu.memory_space<any>> -> memref<1x128xf32, #tpu.memory_space<any>>
    %c3_i32_46 = arith.constant 3 : i32
    %c0_i32_47 = arith.constant 0 : i32
    %70 = tpu.memref_slice %arg3[%c3_i32_46, %c0_i32_47] : memref<8x128xf32, #tpu.memory_space<vmem>> -> memref<1x128xf32, #tpu.memory_space<vmem>>
    %71 = tpu.memref_slice %arg4[%c3_i32_44] : memref<8x!tpu.dma_semaphore, #tpu.memory_space<semaphore_mem>> -> memref<1x!tpu.dma_semaphore, #tpu.memory_space<semaphore_mem>>
    %72 = tpu.memref_squeeze %71 : memref<1x!tpu.dma_semaphore, #tpu.memory_space<semaphore_mem>> -> memref<!tpu.dma_semaphore, #tpu.memory_space<semaphore_mem>>
    tpu.wait_dma2 semaphore(%72 : memref<!tpu.dma_semaphore, #tpu.memory_space<semaphore_mem>>) src(%69 : memref<1x128xf32, #tpu.memory_space<any>>) dst(%70 : memref<1x128xf32, #tpu.memory_space<vmem>>)
    %c4_i32_48 = arith.constant 4 : i32
    %c0_i32_49 = arith.constant 0 : i32
    %73 = tpu.memref_slice %arg2[%31, %c0_i32_49] : memref<17x128xf32, #tpu.memory_space<any>> -> memref<1x128xf32, #tpu.memory_space<any>>
    %c4_i32_50 = arith.constant 4 : i32
    %c0_i32_51 = arith.constant 0 : i32
    %74 = tpu.memref_slice %arg3[%c4_i32_50, %c0_i32_51] : memref<8x128xf32, #tpu.memory_space<vmem>> -> memref<1x128xf32, #tpu.memory_space<vmem>>
    %75 = tpu.memref_slice %arg4[%c4_i32_48] : memref<8x!tpu.dma_semaphore, #tpu.memory_space<semaphore_mem>> -> memref<1x!tpu.dma_semaphore, #tpu.memory_space<semaphore_mem>>
    %76 = tpu.memref_squeeze %75 : memref<1x!tpu.dma_semaphore, #tpu.memory_space<semaphore_mem>> -> memref<!tpu.dma_semaphore, #tpu.memory_space<semaphore_mem>>
    tpu.wait_dma2 semaphore(%76 : memref<!tpu.dma_semaphore, #tpu.memory_space<semaphore_mem>>) src(%73 : memref<1x128xf32, #tpu.memory_space<any>>) dst(%74 : memref<1x128xf32, #tpu.memory_space<vmem>>)
    %c5_i32_52 = arith.constant 5 : i32
    %c0_i32_53 = arith.constant 0 : i32
    %77 = tpu.memref_slice %arg2[%38, %c0_i32_53] : memref<17x128xf32, #tpu.memory_space<any>> -> memref<1x128xf32, #tpu.memory_space<any>>
    %c5_i32_54 = arith.constant 5 : i32
    %c0_i32_55 = arith.constant 0 : i32
    %78 = tpu.memref_slice %arg3[%c5_i32_54, %c0_i32_55] : memref<8x128xf32, #tpu.memory_space<vmem>> -> memref<1x128xf32, #tpu.memory_space<vmem>>
    %79 = tpu.memref_slice %arg4[%c5_i32_52] : memref<8x!tpu.dma_semaphore, #tpu.memory_space<semaphore_mem>> -> memref<1x!tpu.dma_semaphore, #tpu.memory_space<semaphore_mem>>
    %80 = tpu.memref_squeeze %79 : memref<1x!tpu.dma_semaphore, #tpu.memory_space<semaphore_mem>> -> memref<!tpu.dma_semaphore, #tpu.memory_space<semaphore_mem>>
    tpu.wait_dma2 semaphore(%80 : memref<!tpu.dma_semaphore, #tpu.memory_space<semaphore_mem>>) src(%77 : memref<1x128xf32, #tpu.memory_space<any>>) dst(%78 : memref<1x128xf32, #tpu.memory_space<vmem>>)
    %c6_i32_56 = arith.constant 6 : i32
    %c0_i32_57 = arith.constant 0 : i32
    %81 = tpu.memref_slice %arg2[%45, %c0_i32_57] : memref<17x128xf32, #tpu.memory_space<any>> -> memref<1x128xf32, #tpu.memory_space<any>>
    %c6_i32_58 = arith.constant 6 : i32
    %c0_i32_59 = arith.constant 0 : i32
    %82 = tpu.memref_slice %arg3[%c6_i32_58, %c0_i32_59] : memref<8x128xf32, #tpu.memory_space<vmem>> -> memref<1x128xf32, #tpu.memory_space<vmem>>
    %83 = tpu.memref_slice %arg4[%c6_i32_56] : memref<8x!tpu.dma_semaphore, #tpu.memory_space<semaphore_mem>> -> memref<1x!tpu.dma_semaphore, #tpu.memory_space<semaphore_mem>>
    %84 = tpu.memref_squeeze %83 : memref<1x!tpu.dma_semaphore, #tpu.memory_space<semaphore_mem>> -> memref<!tpu.dma_semaphore, #tpu.memory_space<semaphore_mem>>
    tpu.wait_dma2 semaphore(%84 : memref<!tpu.dma_semaphore, #tpu.memory_space<semaphore_mem>>) src(%81 : memref<1x128xf32, #tpu.memory_space<any>>) dst(%82 : memref<1x128xf32, #tpu.memory_space<vmem>>)
    %c7_i32_60 = arith.constant 7 : i32
    %c0_i32_61 = arith.constant 0 : i32
    %85 = tpu.memref_slice %arg2[%52, %c0_i32_61] : memref<17x128xf32, #tpu.memory_space<any>> -> memref<1x128xf32, #tpu.memory_space<any>>
    %c7_i32_62 = arith.constant 7 : i32
    %c0_i32_63 = arith.constant 0 : i32
    %86 = tpu.memref_slice %arg3[%c7_i32_62, %c0_i32_63] : memref<8x128xf32, #tpu.memory_space<vmem>> -> memref<1x128xf32, #tpu.memory_space<vmem>>
    %87 = tpu.memref_slice %arg4[%c7_i32_60] : memref<8x!tpu.dma_semaphore, #tpu.memory_space<semaphore_mem>> -> memref<1x!tpu.dma_semaphore, #tpu.memory_space<semaphore_mem>>
    %88 = tpu.memref_squeeze %87 : memref<1x!tpu.dma_semaphore, #tpu.memory_space<semaphore_mem>> -> memref<!tpu.dma_semaphore, #tpu.memory_space<semaphore_mem>>
    tpu.wait_dma2 semaphore(%88 : memref<!tpu.dma_semaphore, #tpu.memory_space<semaphore_mem>>) src(%85 : memref<1x128xf32, #tpu.memory_space<any>>) dst(%86 : memref<1x128xf32, #tpu.memory_space<vmem>>)
    return
  }
  func.func @transform_1(%arg0: i32, %arg1: memref<8xi32, #tpu.memory_space<smem>>) -> (i32, i32) {
    %c0_i32 = arith.constant 0 : i32
    %c0_i32_0 = arith.constant 0 : i32
    return %arg0, %c0_i32 : i32, i32
  }
}

</mosaic_0001>

<bundles_post_ra>
// kernel: tpu_custom_call.1
= control target key start
LH: loop header
LB: loop body
LE: loop exit
PB: predicated region body
PF: predicated region fallthrough
CT: control target
= control target key end

     0   :  { %s526_s12 = smov [#allocation4]   ;;  %s648_s0 = inlined_call_operand.hbm [shape: s32[8], index: 0, kind: input, shape index: {}]   ;;  %s649_s1 = inlined_call_operand.hbm [shape: f32[17,128], index: 1, kind: input, shape index: {}]   ;;  %s650_s2 = inlined_call_operand.hbm [shape: f32[8,128], index: 2, kind: output, shape index: {}]  }
   0x1   :  { %s8_s11 = sshll.u32 %s648_s0, 4  ;;  %s9_s11 = int_to_ptr.hbm [resolvable:$true] %s8_s11 }
   0x2   :  { %11 = dma.hbm_to_smem %s9_s11, 16, %s526_s12, [#allocation3] }
   0x3   :  { %506 = dma.done.wait [#allocation3], 16 }
   0x4   :  { %507 = vsyncadd [#allocation3], 4294967280 }
   0x5   :  { %14 = sfence }
   0x6   :  { %15 = vsyncpa [#allocation6], 0  ;;  %s17_s13 = sld [smem:[#allocation4]]  ;;  %s527_s14 = smov [#allocation5]  }
   0x7   :  { %s553_s15 = sshll.u32 %s527_s14, 4  ;;  %s254_s16 = sld [smem:[#allocation4 + $0x1]]  ;;  %s29_s15 = int_to_ptr.vmem [resolvable:$true] %s553_s15 }
   0x8   :  { %s528_s17 = smov [#allocation5 + $0x1]   ;;  %s558_s19 = sld [smem:[#allocation4 + $0x2]] }
   0x9   :  { %s556_s18 = sshll.u32 %s528_s17, 4  ;;  %s529_s0 = smov [#allocation5 + $0x2]   ;;  %s47_s18 = int_to_ptr.vmem [resolvable:$true] %s556_s18 }
   0xa   :  { %s561_s20 = sshll.u32 %s529_s0, 4  ;;  %s563_s21 = sld [smem:[#allocation4 + $0x3]]  ;;  %s65_s20 = int_to_ptr.vmem [resolvable:$true] %s561_s20 }
   0xb   :  { %s575_s6 = scalar_lea.hbm %s649_s1, 24 }
   0xc   :  { %s18_s24 = scalar_lea.hbm %s649_s1, %s17_s13 }
   0xd   :  { %s26_s25 = sshll.u32 %s18_s24, 4  ;;  %s34_s28 = scalar_lea.hbm %s649_s1, %s254_s16  ;;  %s27_s25 = int_to_ptr.hbm [resolvable:$true] %s26_s25 }
   0xe   :  { %s44_s29 = sshll.u32 %s34_s28, 4  ;;  %s290_s30 = sshra.s32 %s27_s25, 4  ;;  %s291_s30 = int_to_ptr.hbm [resolvable:$true] %s290_s30  ;;  %s45_s29 = int_to_ptr.hbm [resolvable:$true] %s44_s29 }
   0xf   :  { %s292_s3 = scalar_lea.hbm %s291_s30, 1  ;;  %p295_p1 = scmp.lt.s32.totalorder %s291_s30, %s649_s1 }
  0x10   :  { %p293_p0 = scmp.ne.s32.totalorder %s291_s30, %s292_s3  ;;  %p296_p2 = scmp.lt.s32.totalorder %s575_s6, %s292_s3 }
  0x12   :  { %p297_p3 = por %p296_p2, %p295_p1 }
  0x14   :  { %p298_p4 = pnand %p297_p3, %p293_p0 }
  0x16   :  { %301 = shalt.err (!%p298_p4)  }
  0x17   :  { %31 = dma.hbm_to_vmem [thread:$0]  %s27_s25, 16, %s29_s15, [#allocation2] }
  0x18   :  { %s52_s11 = scalar_lea.hbm %s649_s1, %s558_s19  ;;  %s314_s12 = sshra.s32 %s45_s29, 4  ;;  %s315_s12 = int_to_ptr.hbm [resolvable:$true] %s314_s12 }
  0x19   :  { %s316_s13 = scalar_lea.hbm %s315_s12, 1  ;;  %p319_p6 = scmp.lt.s32.totalorder %s315_s12, %s649_s1 }
  0x1a   :  { %p317_p5 = scmp.ne.s32.totalorder %s315_s12, %s316_s13  ;;  %p320_p7 = scmp.lt.s32.totalorder %s575_s6, %s316_s13 }
  0x1c   :  { %p321_p8 = por %p320_p7, %p319_p6 }
  0x1e   :  { %p322_p9 = pnand %p321_p8, %p317_p5 }
  0x20   :  { %325 = shalt.err (!%p322_p9)  }
  0x21   :  { %49 = dma.hbm_to_vmem [thread:$0]  %s45_s29, 16, %s47_s18, [#allocation2 + $0x1] }
  0x22   :  { %s62_s17 = sshll.u32 %s52_s11, 4  ;;  %s70_s22 = scalar_lea.hbm %s649_s1, %s563_s21  ;;  %s63_s17 = int_to_ptr.hbm [resolvable:$true] %s62_s17 }
  0x23   :  { %s80_s23 = sshll.u32 %s70_s22, 4  ;;  %s338_s24 = sshra.s32 %s63_s17, 4  ;;  %s339_s24 = int_to_ptr.hbm [resolvable:$true] %s338_s24  ;;  %s81_s23 = int_to_ptr.hbm [resolvable:$true] %s80_s23 }
  0x24   :  { %s340_s25 = scalar_lea.hbm %s339_s24, 1  ;;  %p343_p11 = scmp.lt.s32.totalorder %s339_s24, %s649_s1 }
  0x25   :  { %p341_p10 = scmp.ne.s32.totalorder %s339_s24, %s340_s25  ;;  %p344_p12 = scmp.lt.s32.totalorder %s575_s6, %s340_s25 }
  0x27   :  { %p345_p13 = por %p344_p12, %p343_p11 }
  0x29   :  { %p346_p0 = pnand %p345_p13, %p341_p10 }
  0x2b   :  { %349 = shalt.err (!%p346_p0)  }
  0x2c   :  { %67 = dma.hbm_to_vmem [thread:$0]  %s63_s17, 16, %s65_s20, [#allocation2 + $0x2] }
  0x2d   :  { %s530_s18 = smov [#allocation5 + $0x3]   ;;  %s257_s28 = sld [smem:[#allocation4 + $0x4]] }
  0x2e   :  { %s82_s21 = sshll.u32 %s530_s18, 4  ;;  %s362_s29 = sshra.s32 %s81_s23, 4  ;;  %s83_s21 = int_to_ptr.vmem [resolvable:$true] %s82_s21  ;;  %s363_s29 = int_to_ptr.hbm [resolvable:$true] %s362_s29 }
  0x2f   :  { %s364_s30 = scalar_lea.hbm %s363_s29, 1  ;;  %p367_p2 = scmp.lt.s32.totalorder %s363_s29, %s649_s1 }
  0x30   :  { %p365_p1 = scmp.ne.s32.totalorder %s363_s29, %s364_s30  ;;  %p368_p3 = scmp.lt.s32.totalorder %s575_s6, %s364_s30 }
  0x32   :  { %p369_p4 = por %p368_p3, %p367_p2 }
  0x34   :  { %p370_p5 = pnand %p369_p4, %p365_p1 }
  0x36   :  { %373 = shalt.err (!%p370_p5)  }
  0x37   :  { %85 = dma.hbm_to_vmem [thread:$0]  %s81_s23, 16, %s83_s21, [#allocation2 + $0x3] }
  0x38   :  { %s531_s5 = smov [#allocation5 + $0x4]   ;;  %s258_s7 = sld [smem:[#allocation4 + $0x5]] }
  0x39   :  { %s100_s20 = sshll.u32 %s531_s5, 4  ;;  %s532_s8 = smov [#allocation5 + $0x5]   ;;  %s101_s20 = int_to_ptr.vmem [resolvable:$true] %s100_s20 }
  0x3a   :  { %s607_s9 = sshll.u32 %s532_s8, 4  ;;  %s259_s10 = sld [smem:[#allocation4 + $0x6]]  ;;  %s119_s9 = int_to_ptr.vmem [resolvable:$true] %s607_s9 }
  0x3b   :  { %s88_s13 = scalar_lea.hbm %s649_s1, %s257_s28  ;;  %s533_s16 = smov [#allocation5 + $0x6]  }
  0x3c   :  { %s98_s14 = sshll.u32 %s88_s13, 4  ;;  %s613_s17 = sshll.u32 %s533_s16, 4  ;;  %s99_s14 = int_to_ptr.hbm [resolvable:$true] %s98_s14  ;;  %s137_s17 = int_to_ptr.vmem [resolvable:$true] %s613_s17 }
  0x3d   :  { %s386_s0 = sshra.s32 %s99_s14, 4  ;;  %s387_s0 = int_to_ptr.hbm [resolvable:$true] %s386_s0 }
  0x3e   :  { %s388_s19 = scalar_lea.hbm %s387_s0, 1  ;;  %p391_p7 = scmp.lt.s32.totalorder %s387_s0, %s649_s1 }
  0x3f   :  { %p389_p6 = scmp.ne.s32.totalorder %s387_s0, %s388_s19  ;;  %p392_p8 = scmp.lt.s32.totalorder %s575_s6, %s388_s19 }
  0x41   :  { %p393_p9 = por %p392_p8, %p391_p7 }
  0x43   :  { %p394_p10 = pnand %p393_p9, %p389_p6 }
  0x45   :  { %397 = shalt.err (!%p394_p10)  }
  0x46   :  { %103 = dma.hbm_to_vmem [thread:$0]  %s99_s14, 16, %s101_s20, [#allocation2 + $0x4] }
  0x47   :  { %s106_s26 = scalar_lea.hbm %s649_s1, %s258_s7  ;;  %s124_s28 = scalar_lea.hbm %s649_s1, %s259_s10 }
  0x48   :  { %s116_s27 = sshll.u32 %s106_s26, 4  ;;  %s134_s29 = sshll.u32 %s124_s28, 4  ;;  %s117_s27 = int_to_ptr.hbm [resolvable:$true] %s116_s27  ;;  %s135_s29 = int_to_ptr.hbm [resolvable:$true] %s134_s29 }
  0x49   :  { %s410_s30 = sshra.s32 %s117_s27, 4  ;;  %s411_s30 = int_to_ptr.hbm [resolvable:$true] %s410_s30 }
  0x4a   :  { %s412_s3 = scalar_lea.hbm %s411_s30, 1  ;;  %p415_p12 = scmp.lt.s32.totalorder %s411_s30, %s649_s1 }
  0x4b   :  { %p413_p11 = scmp.ne.s32.totalorder %s411_s30, %s412_s3  ;;  %p416_p13 = scmp.lt.s32.totalorder %s575_s6, %s412_s3 }
  0x4d   :  { %p417_p0 = por %p416_p13, %p415_p12 }
  0x4f   :  { %p418_p1 = pnand %p417_p0, %p413_p11 }
  0x51   :  { %421 = shalt.err (!%p418_p1)  }
  0x52   :  { %121 = dma.hbm_to_vmem [thread:$0]  %s117_s27, 16, %s119_s9, [#allocation2 + $0x5] }
  0x53   :  { %s260_s20 = sld [smem:[#allocation4 + $0x7]]  ;;  %s434_s7 = sshra.s32 %s135_s29, 4  ;;  %s435_s7 = int_to_ptr.hbm [resolvable:$true] %s434_s7 }
  0x54   :  { %s436_s8 = scalar_lea.hbm %s435_s7, 1  ;;  %p439_p3 = scmp.lt.s32.totalorder %s435_s7, %s649_s1 }
  0x55   :  { %p437_p2 = scmp.ne.s32.totalorder %s435_s7, %s436_s8  ;;  %p440_p4 = scmp.lt.s32.totalorder %s575_s6, %s436_s8 }
  0x57   :  { %p441_p5 = por %p440_p4, %p439_p3 }
  0x59   :  { %p442_p6 = pnand %p441_p5, %p437_p2 }
  0x5b   :  { %445 = shalt.err (!%p442_p6)  }
  0x5c   :  { %139 = dma.hbm_to_vmem [thread:$0]  %s135_s29, 16, %s137_s17, [#allocation2 + $0x6] }
  0x5d   :  { %s534_s12 = smov [#allocation5 + $0x7]   ;;  %s142_s16 = scalar_lea.hbm %s649_s1, %s260_s20 }
  0x5e   :  { %s154_s13 = sshll.u32 %s534_s12, 4  ;;  %s152_s0 = sshll.u32 %s142_s16, 4  ;;  %s155_s13 = int_to_ptr.vmem [resolvable:$true] %s154_s13  ;;  %s153_s0 = int_to_ptr.hbm [resolvable:$true] %s152_s0 }
  0x5f   :  { %s458_s19 = sshra.s32 %s153_s0, 4  ;;  %s459_s19 = int_to_ptr.hbm [resolvable:$true] %s458_s19 }
  0x60   :  { %s460_s22 = scalar_lea.hbm %s459_s19, 1  ;;  %p463_p8 = scmp.lt.s32.totalorder %s459_s19, %s649_s1 }
  0x61   :  { %p461_p7 = scmp.ne.s32.totalorder %s459_s19, %s460_s22  ;;  %p464_p9 = scmp.lt.s32.totalorder %s575_s6, %s460_s22 }
  0x63   :  { %p465_p10 = por %p464_p9, %p463_p8 }
  0x65   :  { %p466_p11 = pnand %p465_p10, %p461_p7 }
  0x67   :  { %469 = shalt.err (!%p466_p11)  }
  0x68   :  { %157 = dma.hbm_to_vmem [thread:$0]  %s153_s0, 16, %s155_s13, [#allocation2 + $0x7] }
  0x69   :  { %508 = dma.done.wait [#allocation2], 16 }
  0x6a   :  { %509 = vsyncadd [#allocation2], 4294967280 }
  0x6b   :  { %510 = dma.done.wait [#allocation2 + $0x1], 16 }
  0x6c   :  { %511 = vsyncadd [#allocation2 + $0x1], 4294967280 }
  0x6d   :  { %512 = dma.done.wait [#allocation2 + $0x2], 16 }
  0x6e   :  { %513 = vsyncadd [#allocation2 + $0x2], 4294967280 }
  0x6f   :  { %514 = dma.done.wait [#allocation2 + $0x3], 16 }
  0x70   :  { %515 = vsyncadd [#allocation2 + $0x3], 4294967280 }
  0x71   :  { %516 = dma.done.wait [#allocation2 + $0x4], 16 }
  0x72   :  { %517 = vsyncadd [#allocation2 + $0x4], 4294967280 }
  0x73   :  { %518 = dma.done.wait [#allocation2 + $0x5], 16 }
  0x74   :  { %519 = vsyncadd [#allocation2 + $0x5], 4294967280 }
  0x75   :  { %520 = dma.done.wait [#allocation2 + $0x6], 16 }
  0x76   :  { %521 = vsyncadd [#allocation2 + $0x6], 4294967280 }
  0x77   :  { %522 = dma.done.wait [#allocation2 + $0x7], 16 }
  0x78   :  { %523 = vsyncadd [#allocation2 + $0x7], 4294967280  ;;  %s182_s17 = sshll.u32 %s650_s2, 4  ;;  %s183_s17 = int_to_ptr.hbm [resolvable:$true] %s182_s17 }
  0x79   :  { %185 = dma.vmem_to_hbm [thread:$0]  %s29_s15, 128, %s183_s17, [#allocation6]  }
  0x7a   :  { %524 = dma.done.wait [#allocation6], 128  }
  0x7b   :  { %525 = vsyncadd [#allocation6], 4294967168 }
  0x7c   :  { %190 = vsyncpa [#allocation6], 1 }
  0x7d   :  { %191 = vsyncmov [#allocation2] }
  0x80   :  { %s192_s25 = vpop.sfrf %191 }
  0x81   :  { %p261_p12 = scmp.ne.s32.totalorder %s192_s25, 0 }
  0x83   :  { %196 = shalt.err (%p261_p12)  }
  0x84   :  { %198 = vsyncmov [#allocation2 + $0x1] }
  0x87   :  { %s199_s26 = vpop.sfrf %198 }
  0x88   :  { %p262_p13 = scmp.ne.s32.totalorder %s199_s26, 0 }
  0x8a   :  { %203 = shalt.err (%p262_p13)  }
  0x8b   :  { %205 = vsyncmov [#allocation2 + $0x2] }
  0x8e   :  { %s206_s27 = vpop.sfrf %205 }
  0x8f   :  { %p263_p0 = scmp.ne.s32.totalorder %s206_s27, 0 }
  0x91   :  { %210 = shalt.err (%p263_p0)  }
  0x92   :  { %212 = vsyncmov [#allocation2 + $0x3] }
  0x95   :  { %s213_s2 = vpop.sfrf %212 }
  0x96   :  { %p264_p1 = scmp.ne.s32.totalorder %s213_s2, 0 }
  0x98   :  { %217 = shalt.err (%p264_p1)  }
  0x99   :  { %219 = vsyncmov [#allocation2 + $0x4] }
  0x9c   :  { %s220_s15 = vpop.sfrf %219 }
  0x9d   :  { %p265_p2 = scmp.ne.s32.totalorder %s220_s15, 0 }
  0x9f   :  { %224 = shalt.err (%p265_p2)  }
  0xa0   :  { %226 = vsyncmov [#allocation2 + $0x5] }
  0xa3   :  { %s227_s18 = vpop.sfrf %226 }
  0xa4   :  { %p266_p3 = scmp.ne.s32.totalorder %s227_s18, 0 }
  0xa6   :  { %231 = shalt.err (%p266_p3)  }
  0xa7   :  { %233 = vsyncmov [#allocation2 + $0x6] }
  0xaa   :  { %s234_s21 = vpop.sfrf %233 }
  0xab   :  { %p267_p4 = scmp.ne.s32.totalorder %s234_s21, 0 }
  0xad   :  { %238 = shalt.err (%p267_p4)  }
  0xae   :  { %240 = vsyncmov [#allocation2 + $0x7] }
  0xb1   :  { %s241_s28 = vpop.sfrf %240 }
  0xb2   :  { %p268_p5 = scmp.ne.s32.totalorder %s241_s28, 0 }
  0xb4   :  { %245 = shalt.err (%p268_p5)  }

</bundles_post_ra>
